<compile_context>
chip_gen: v5e
topology: v5e:2x2
jax: 0.10.0
libtpu: 0.0.40
codegen_flags: <defaults>
</compile_context>

<pallas_src>
import math

import jax
import jax.numpy as jnp
from jax.experimental import pallas as pl
from jax.experimental.pallas import tpu as pltpu


def _cdiv(a, b):
    return -(-a // b)


def _round_up(n, m):
    return _cdiv(n, m) * m


def _round_down(n, m):
    return (n // m) * m


def _vmem_plan():
    """(per-X-buffer byte budget, scoped VMEM limit) per TPU generation."""
    phys = None
    try:
        info = pltpu.get_tpu_info()
        phys = int(getattr(info, "vmem_capacity_bytes"))
    except Exception:
        phys = None
    if phys is not None and phys >= 128 * 1024 * 1024:
        # v5e / v6e: 128 MiB physical VMEM -> big tiles, raised scoped limit.
        return 24 * 1024 * 1024, 96 * 1024 * 1024
    # v7x (64 MiB physical) or unknown generation: conservative.
    return 12 * 1024 * 1024, 40 * 1024 * 1024


def _num_tensorcores():
    """Best-effort TensorCores-per-device count (2 on v7x, else 1)."""
    try:
        kind = jax.devices()[0].device_kind.lower()
    except Exception:
        return 1
    return 2 if "v7" in kind else 1


def _pick_tile_rows(total_rows, row_bytes, gran, per_buf_bytes, n_cores):
    """Row-tile size: byte-budgeted, `gran`-aligned, <= total_rows.
    Splits into several programs only on multi-TensorCore parts."""
    t = max(gran, _round_down(per_buf_bytes // max(row_bytes, 1), gran))
    t = min(t, max(gran, _round_down(total_rows, gran)))
    if n_cores > 1 and total_rows > gran:
        # Aim for >= 2*n_cores balanced programs, but keep tiles >= ~2 MiB.
        floor_rows = max(gran, _round_down((2 * 1024 * 1024) // row_bytes, gran))
        target = _round_up(_cdiv(total_rows, 2 * n_cores), gran)
        t = min(t, max(floor_rows, target))
        t = min(t, max(gran, _round_down(total_rows, gran)))
    return t


# ----------------------------------------------------------------------------
# Kernels
# ----------------------------------------------------------------------------

def _packed_score_kernel(x_ref, w_ref, o_ref):
    # x_ref: (TR, 128)  packed X rows (128/D consecutive X rows per packed row)
    # w_ref: (128, G)   block-diagonal replication of w (resident)
    # o_ref: (TR, G)    f32; o[r, g] = score(X row r*G + g)
    o_ref[...] = jnp.dot(x_ref[...], w_ref[...],
                         preferred_element_type=jnp.float32)


def _row_score_kernel(x_ref, w_ref, o_ref):
    # x_ref: (TN, D) tile of X; w_ref: (1, D) resident; o_ref: (1, TN)
    # Contract over D so the batch dimension lands on the lane axis.
    o_ref[...] = jax.lax.dot_general(
        w_ref[...], x_ref[...],
        dimension_numbers=(((1,), (1,)), ((), ())),
        preferred_element_type=jnp.float32)


# ----------------------------------------------------------------------------
# Wrappers
# ----------------------------------------------------------------------------

def _packed_score(X, w):
    """Fast path: 128 % D == 0 and N % (128//D) == 0.  Zero-copy lane-dense
    view of X, standard-orientation MXU matmul, no lane padding in VMEM."""
    N, D = X.shape
    G = 128 // D
    R = N // G                       # packed rows; each holds G X rows
    dt = X.dtype
    row_bytes = 128 * dt.itemsize    # packed rows are exactly 128 lanes wide
    per_buf, vmem_limit = _vmem_plan()
    gran = 16                        # valid sublane tiling for f32 and bf16
    tile_r = _pick_tile_rows(R, row_bytes, gran, per_buf, _num_tensorcores())
    n_tiles = _cdiv(R, tile_r)

    X2 = X.reshape(R, 128)           # contiguous row-major: bitcast reshape
    # Block-diagonal replication of w: w_blk[g*D + d, g] = w[d]
    w_blk = jnp.kron(jnp.eye(G, dtype=jnp.float32),
                     jnp.asarray(w, jnp.float32).reshape(D, 1)).astype(dt)

    out = pl.pallas_call(
        _packed_score_kernel,
        out_shape=jax.ShapeDtypeStruct((n_tiles * tile_r, G), jnp.float32),
        grid_spec=pltpu.PrefetchScalarGridSpec(
            num_scalar_prefetch=0,
            grid=(n_tiles,),
            in_specs=[
                pl.BlockSpec((tile_r, 128), lambda i: (i, 0)),   # packed X
                pl.BlockSpec((128, G), lambda i: (0, 0)),        # w (resident)
            ],
            out_specs=pl.BlockSpec((tile_r, G), lambda i: (i, 0)),
        ),
        compiler_params=pltpu.CompilerParams(
            dimension_semantics=("parallel",),
            vmem_limit_bytes=vmem_limit),
        cost_estimate=pl.CostEstimate(
            flops=2 * N * D,
            bytes_accessed=N * D * dt.itemsize + N * 4 + 128 * G * dt.itemsize,
            transcendentals=0),
    )(X2, w_blk)
    # out[r, g] == score(r*G + g): row-major flatten is exactly score order.
    return out.reshape(-1)[:N]


def _generic_score(X, w):
    """General path (any D, ragged N handled by a cdiv grid, no full-array
    pad).  Output is a lane-dense (1, tile_n) row per grid step."""
    N, D = X.shape
    dt = X.dtype
    gran = 128                       # lane-dense output + bf16 sublane tiling
    if N < gran:                     # tiny batch: pad a handful of rows
        X = jnp.pad(X, ((0, gran - N), (0, 0)))
    Np = X.shape[0]
    # Lane-padding-aware VMEM accounting: a (tile_n, D) block stores D padded
    # up to a multiple of 128 lanes.
    row_bytes = _round_up(D, 128) * dt.itemsize
    per_buf, vmem_limit = _vmem_plan()
    tile_n = _pick_tile_rows(Np, row_bytes, gran, per_buf, _num_tensorcores())
    n_tiles = _cdiv(Np, tile_n)
    w_row = jnp.asarray(w, jnp.float32).reshape(1, D).astype(dt)

    out = pl.pallas_call(
        _row_score_kernel,
        out_shape=jax.ShapeDtypeStruct((1, n_tiles * tile_n), jnp.float32),
        grid_spec=pltpu.PrefetchScalarGridSpec(
            num_scalar_prefetch=0,
            grid=(n_tiles,),
            in_specs=[
                pl.BlockSpec((tile_n, D), lambda i: (i, 0)),     # X row tile
                pl.BlockSpec((1, D), lambda i: (0, 0)),          # w (resident)
            ],
            out_specs=pl.BlockSpec((1, tile_n), lambda i: (0, i)),
        ),
        compiler_params=pltpu.CompilerParams(
            dimension_semantics=("parallel",),
            vmem_limit_bytes=vmem_limit),
        cost_estimate=pl.CostEstimate(
            flops=2 * N * D,
            bytes_accessed=N * D * dt.itemsize + N * 4 + D * dt.itemsize,
            transcendentals=0),
    )(X, w_row)
    return out.reshape(-1)[:N]


def strategic_score(X, w, b):
    """Computes X @ w + b with a Pallas TPU kernel.

    X: (N, D) float32 or bfloat16 (no wrapper-side cast); w: (D,); b: ()/(1,).
    Returns (N,) float32.
    """
    X = jnp.asarray(X)
    if X.dtype != jnp.float32 and X.dtype != jnp.bfloat16:
        X = X.astype(jnp.float32)
    N, D = X.shape
    bias = jnp.asarray(b, jnp.float32).reshape(-1)[0]

    if 1 <= D <= 128 and 128 % D == 0:
        G = 128 // D
        min_n = 16 * G
        if N % G == 0 and N >= min_n:
            return _packed_score(X, w) + bias          # zero-copy fast path
        if N < min_n:
            # Tiny batch: padding a few rows is negligible; keep the fast path.
            Np = _round_up(max(N, min_n), G)
            Xp = jnp.pad(X, ((0, Np - N), (0, 0)))
            return _packed_score(Xp, w)[:N] + bias
        # Large ragged N (N % G != 0): use the generic kernel's ragged grid
        # instead of paying a full-array pad copy of X.
    return _generic_score(X, w) + bias


class MyStrategicModelPallas:
    """JAX/Pallas port of MyStrategicModel (forward pass, strategic=False)."""

    def __init__(self, x_dim, train_slope=1.0, eval_slope=1.0, scale=1.0,
                 strategic=False, key=None):
        self.x_dim = x_dim
        self.train_slope, self.eval_slope = train_slope, eval_slope
        self.scale = scale
        self.strategic = strategic
        if key is None:
            key = jax.random.PRNGKey(0)
        kw, kb = jax.random.split(key)
        # matches torch init distribution: sqrt(1/x_dim) * (1 - 2*U[0,1))
        c = math.sqrt(1.0 / x_dim)
        self.w = c * (1.0 - 2.0 * jax.random.uniform(kw, (x_dim,), jnp.float32))
        self.b = c * (1.0 - 2.0 * jax.random.uniform(kb, (1,), jnp.float32))

    def score(self, X):
        return strategic_score(X, self.w, self.b)

    def forward(self, X, evaluation=False):
        if self.strategic:
            # TODO(synk): VanilaCCP / VanilaDelta convex optimization of X has
            # no Pallas equivalent (iterative cvxpy-style solver, not provided).
            raise NotImplementedError("strategic branch not translatable")
        return self.score(X)

    def get_f_ders(self, XT, slope):
        # elementwise post-processing of the kernel's score output (glue JAX)
        s = slope * self.score(XT) + 1.0
        coef = 0.5 * slope * (s / jnp.sqrt(s * s + 1.0))     # (N,)
        return coef[:, None] * self.w[None, :]               # (N, x_dim)


if __name__ == "__main__":
    x_dim = 32
    key = jax.random.PRNGKey(0)
    kx, kparam, kgen = jax.random.split(key, 3)

    model = MyStrategicModelPallas(x_dim, train_slope=2.0, eval_slope=5.0,
                                   scale=1.0, strategic=False, key=kparam)

    # Packed fast path (D | 128): ragged-grid, tiny-batch and ragged-N cases.
    for N in (160, 16, 19):
        X = jax.random.normal(jax.random.fold_in(kx, N), (N, x_dim),
                              jnp.float32)
        out = jax.block_until_ready(model.forward(X))
        ref = X @ model.w + model.b[0]
        assert out.shape == (N,)
        assert jnp.allclose(out, ref, atol=1e-4, rtol=1e-4), (N, out, ref)

    # bf16 inputs provided by the caller (no wrapper cast); f32 accumulation.
    Xb = jax.random.normal(kx, (256, x_dim), jnp.float32)
    out_bf16 = jax.block_until_ready(
        strategic_score(Xb.astype(jnp.bfloat16), model.w, model.b))
    ref_bf16 = Xb @ model.w + model.b[0]
    assert out_bf16.shape == (256,)
    assert jnp.allclose(out_bf16, ref_bf16, atol=5e-2, rtol=5e-2)

    # Generic path (D does not divide 128), ragged N, no full-array pad.
    Dg, Ng = 48, 200
    kxg, kwg, kbg = jax.random.split(kgen, 3)
    Xg = jax.random.normal(kxg, (Ng, Dg), jnp.float32)
    wg = math.sqrt(1.0 / Dg) * (
        1.0 - 2.0 * jax.random.uniform(kwg, (Dg,), jnp.float32))
    bg = math.sqrt(1.0 / Dg) * (
        1.0 - 2.0 * jax.random.uniform(kbg, (1,), jnp.float32))
    out_g = jax.block_until_ready(strategic_score(Xg, wg, bg))
    ref_g = Xg @ wg + bg[0]
    assert out_g.shape == (Ng,)
    assert jnp.allclose(out_g, ref_g, atol=1e-4, rtol=1e-4)

    # get_f_ders glue path (uses the same kernel for the score).
    fd = jax.block_until_ready(model.get_f_ders(Xb, model.train_slope))
    assert fd.shape == (256, x_dim)

    print("KERNEL_OK")
</pallas_src>

<mosaic_0001>
module attributes {stable_mosaic.version = 11 : i64} {
  func.func @_packed_score_kernel(%arg0: i32, %arg1: memref<32x128xf32, #tpu.memory_space<vmem>>, %arg2: memref<128x4xf32, #tpu.memory_space<vmem>>, %arg3: memref<32x4xf32, #tpu.memory_space<vmem>>) attributes {dimension_semantics = [#tpu.dimension_semantics<parallel>], iteration_bounds = array<i64: 2>, scalar_prefetch = 0 : i64, scratch_operands = 0 : i64, tpu.core_type = #tpu.core_type<tc>, window_params = [{transform_indices = @transform_0, window_bounds = array<i64: 32, 128>}, {pipeline_mode = #tpu.pipeline_mode<synchronous>, transform_indices = @transform_1, window_bounds = array<i64: 128, 4>}, {transform_indices = @transform_2, window_bounds = array<i64: 32, 4>}]} {
    %c0 = arith.constant 0 : index
    %c0_0 = arith.constant 0 : index
    %0 = vector.load %arg1[%c0, %c0_0] : memref<32x128xf32, #tpu.memory_space<vmem>>, vector<32x128xf32>
    %c0_1 = arith.constant 0 : index
    %c0_2 = arith.constant 0 : index
    %1 = vector.load %arg2[%c0_1, %c0_2] : memref<128x4xf32, #tpu.memory_space<vmem>>, vector<128x4xf32>
    %cst = arith.constant dense<0.000000e+00> : vector<32x4xf32>
    %2 = tpu.matmul %0, %1, %cst {dimension_numbers = #tpu.dot_dimension_numbers<[1], [0], [0], [1], [0, 0, 1, 1], [], []>} : vector<32x128xf32>, vector<128x4xf32>, vector<32x4xf32> -> vector<32x4xf32>
    %c0_3 = arith.constant 0 : index
    %c0_4 = arith.constant 0 : index
    %3 = vector.load %arg3[%c0_3, %c0_4] : memref<32x4xf32, #tpu.memory_space<vmem>>, vector<32x4xf32>
    tpu.vector_store %arg3[%c0_3, %c0_4], %2 {strides = array<i32>} : memref<32x4xf32, #tpu.memory_space<vmem>>, vector<32x4xf32>,
    return
  }
  func.func @transform_0(%arg0: i32) -> (i32, i32) {
    %c0_i32 = arith.constant 0 : i32
    %c0_i32_0 = arith.constant 0 : i32
    return %arg0, %c0_i32 : i32, i32
  }
  func.func @transform_1(%arg0: i32) -> (i32, i32) {
    %c0_i32 = arith.constant 0 : i32
    %c0_i32_0 = arith.constant 0 : i32
    %c0_i32_1 = arith.constant 0 : i32
    return %c0_i32, %c0_i32_0 : i32, i32
  }
  func.func @transform_2(%arg0: i32) -> (i32, i32) {
    %c0_i32 = arith.constant 0 : i32
    %c0_i32_0 = arith.constant 0 : i32
    return %arg0, %c0_i32 : i32, i32
  }
}

</mosaic_0001>

<bundles_post_ra>
// kernel: tpu_custom_call.1
= control target key start
LH: loop header
LB: loop body
LE: loop exit
PB: predicated region body
PF: predicated region fallthrough
CT: control target
= control target key end

     0   :  { %s367_s9 = smov 0   ;;  %s440_s0 = inlined_call_operand.vmem [shape: f32[40,128], index: 0, kind: input, shape index: {}]   ;;  %s441_s1 = inlined_call_operand.vmem [shape: f32[128,4], index: 1, kind: input, shape index: {}]   ;;  %s442_s2 = inlined_call_operand.vmem [shape: f32[64,4], index: 2, kind: output, shape index: {}]  }
   0x1 LB: > { %s277_s10 = sadd.s32 4294967295, %s350_s9   ;;  %p281_p0 = scmp.ge.s32.totalorder %s350_s9, 1  ;;  %s350_s9 = sphi %s367_s9, %s12_s9  }
   0x2   : > { %p121_p1 = scmp.lt.s32.totalorder %s350_s9, 3 }
   0x4   : > { %p122_p2 = pnand %p281_p0, %p121_p1 }
   0x5   : > { %s401_s27 = sshll.u32 (!%p122_p2), %s277_s10, 2 }
   0x6   : > { %125 = sbr.rel (%p122_p2) target bundleno = 177 (0xb1), region = 28  ;;  %p152_p3 = scmp.lt.s32.totalorder (!%p122_p2), %s401_s27, 4 }
   0x7   : > { %p162_p4 = scmp.lt.s32.totalorder (!%p122_p2), %s401_s27, 7 }
   0xb   : > { %v186_v0 = vld [vmem:[%s441_s1 + $0x78] sm:$0xff]  ;;  %v185_v1 = vld [vmem:[%s441_s1 + $0x70] sm:$0xff]  ;;  %v184_v2 = vld [vmem:[%s441_s1 + $0x68] sm:$0xff]  ;;  %s153_s6 = scalar_select %p152_p3, %s401_s27, 4  ;;  %vm216_vm0 = vcmask 31744  }
   0xc   : > { %289 = vmatpush.msra.mxu2 %v186_v0  ;;  %290 = vmatpush.msra.mxu3 %v186_v0  ;;  %v183_v3 = vld [vmem:[%s441_s1 + $0x60] sm:$0xff]  ;;  %v182_v4 = vld [vmem:[%s441_s1 + $0x58] sm:$0xff]  ;;  %v181_v5 = vld [vmem:[%s441_s1 + $0x50] sm:$0xff]  ;;  %s444_s27 = smov (!%p162_p4, %s401_s27), 7 }
   0xd   : > { %187 = vmatpush.msra.mxu0 %v186_v0  ;;  %288 = vmatpush.msra.mxu1 %v186_v0  ;;  %v180_v6 = vld [vmem:[%s441_s1 + $0x48] sm:$0xff]  ;;  %v179_v7 = vld [vmem:[%s441_s1 + $0x40] sm:$0xff]  ;;  %v178_v8 = vld [vmem:[%s441_s1 + $0x38] sm:$0xff]  ;;  %s283_s12 = sshll.u32 %s153_s6, 3  ;;  %s285_s22 = sshll.u32 %s444_s27, 3 }
   0xe   : > { %292 = vmatpush.msra.mxu2 %v185_v1  ;;  %293 = vmatpush.msra.mxu3 %v185_v1  ;;  %v177_v9 = vld [vmem:[%s441_s1 + $0x30] sm:$0xff]  ;;  %v176_v10 = vld [vmem:[%s441_s1 + $0x28] sm:$0xff]  ;;  %v175_v11 = vld [vmem:[%s441_s1 + $0x20] sm:$0xff]  ;;  %s155_s19 = scalar_lea.vmem %s440_s0, %s283_s12  ;;  %s165_s25 = scalar_lea.vmem %s442_s2, %s285_s22 }
   0xf   : > { %188 = vmatpush.msra.mxu0 %v185_v1  ;;  %291 = vmatpush.msra.mxu1 %v185_v1  ;;  %v174_v12 = vld [vmem:[%s441_s1 + $0x18] sm:$0xff]  ;;  %v173_v13 = vld [vmem:[%s441_s1 + $0x10] sm:$0xff]  ;;  %v172_v14 = vld [vmem:[%s441_s1 + $0x8] sm:$0xff] }
  0x10   : > { %295 = vmatpush.msra.mxu2 %v184_v2  ;;  %296 = vmatpush.msra.mxu3 %v184_v2  ;;  %v171_v15 = vld [vmem:[%s441_s1] sm:$0xff]  ;;  %v169_v16 = vld [vmem:[%s155_s19 + $0x10] sm:$0xff]  ;;  %v170_v17 = vld [vmem:[%s155_s19 + $0x18] sm:$0xff] }
  0x11   : > { %189 = vmatpush.msra.mxu0 %v184_v2  ;;  %294 = vmatpush.msra.mxu1 %v184_v2  ;;  %v167_v18 = vld [vmem:[%s155_s19] sm:$0xff]  ;;  %v168_v19 = vld [vmem:[%s155_s19 + $0x8] sm:$0xff] }
  0x12   : > { %298 = vmatpush.msra.mxu2 %v183_v3  ;;  %299 = vmatpush.msra.mxu3 %v183_v3 }
  0x13   : > { %190 = vmatpush.msra.mxu0 %v183_v3  ;;  %297 = vmatpush.msra.mxu1 %v183_v3 }
  0x14   : > { %301 = vmatpush.msra.mxu2 %v182_v4  ;;  %302 = vmatpush.msra.mxu3 %v182_v4 }
  0x15   : > { %191 = vmatpush.msra.mxu0 %v182_v4  ;;  %300 = vmatpush.msra.mxu1 %v182_v4 }
  0x16   : > { %304 = vmatpush.msra.mxu2 %v181_v5  ;;  %305 = vmatpush.msra.mxu3 %v181_v5 }
  0x17   : > { %192 = vmatpush.msra.mxu0 %v181_v5  ;;  %303 = vmatpush.msra.mxu1 %v181_v5 }
  0x18   : > { %307 = vmatpush.msra.mxu2 %v180_v6  ;;  %308 = vmatpush.msra.mxu3 %v180_v6 }
  0x19   : > { %193 = vmatpush.msra.mxu0 %v180_v6  ;;  %306 = vmatpush.msra.mxu1 %v180_v6 }
  0x1a   : > { %310 = vmatpush.msra.mxu2 %v179_v7  ;;  %311 = vmatpush.msra.mxu3 %v179_v7 }
  0x1b   : > { %194 = vmatpush.msra.mxu0 %v179_v7  ;;  %309 = vmatpush.msra.mxu1 %v179_v7 }
  0x1c   : > { %313 = vmatpush.msra.mxu2 %v178_v8  ;;  %314 = vmatpush.msra.mxu3 %v178_v8 }
  0x1d   : > { %195 = vmatpush.msra.mxu0 %v178_v8  ;;  %312 = vmatpush.msra.mxu1 %v178_v8 }
  0x1e   : > { %316 = vmatpush.msra.mxu2 %v177_v9  ;;  %317 = vmatpush.msra.mxu3 %v177_v9 }
  0x1f   : > { %196 = vmatpush.msra.mxu0 %v177_v9  ;;  %315 = vmatpush.msra.mxu1 %v177_v9 }
  0x20   : > { %319 = vmatpush.msra.mxu2 %v176_v10  ;;  %320 = vmatpush.msra.mxu3 %v176_v10 }
  0x21   : > { %197 = vmatpush.msra.mxu0 %v176_v10  ;;  %318 = vmatpush.msra.mxu1 %v176_v10 }
  0x22   : > { %322 = vmatpush.msra.mxu2 %v175_v11  ;;  %323 = vmatpush.msra.mxu3 %v175_v11 }
  0x23   : > { %198 = vmatpush.msra.mxu0 %v175_v11  ;;  %321 = vmatpush.msra.mxu1 %v175_v11 }
  0x24   : > { %325 = vmatpush.msra.mxu2 %v174_v12  ;;  %326 = vmatpush.msra.mxu3 %v174_v12 }
  0x25   : > { %199 = vmatpush.msra.mxu0 %v174_v12  ;;  %324 = vmatpush.msra.mxu1 %v174_v12 }
  0x26   : > { %328 = vmatpush.msra.mxu2 %v173_v13  ;;  %329 = vmatpush.msra.mxu3 %v173_v13 }
  0x27   : > { %200 = vmatpush.msra.mxu0 %v173_v13  ;;  %327 = vmatpush.msra.mxu1 %v173_v13 }
  0x28   : > { %331 = vmatpush.msra.mxu2 %v172_v14  ;;  %332 = vmatpush.msra.mxu3 %v172_v14 }
  0x29   : > { %201 = vmatpush.msra.mxu0 %v172_v14  ;;  %330 = vmatpush.msra.mxu1 %v172_v14 }
  0x2a   : > { %334 = vmatpush.msra.mxu2 %v171_v15  ;;  %335 = vmatpush.msra.mxu3 %v171_v15 }
  0x2b   : > { %209 = vmatmul.f32.vlgmr.msra.gmra.mxu2 %v169_v16  ;;  %212 = vmatmul.f32.vlgmr.msra.gmra.mxu3 %v170_v17 }
  0x2c   : > { %202 = vmatpush.msra.mxu0 %v171_v15  ;;  %333 = vmatpush.msra.mxu1 %v171_v15 }
  0x2d   : > { %203 = vmatmul.f32.vlgmr.msra.gmra.mxu0 %v167_v18  ;;  %206 = vmatmul.f32.vlgmr.msra.gmra.mxu1 %v168_v19 }
  0xaa   : > { %v204_v20 = vpop.f32.mrf.mxu0  ;;  %v207_v21 = vpop.f32.mrf.mxu1 }
  0xab   : > { %217 = vst.msk [vmem:[%s165_s25] sm:$0xff] %vm216_vm0, %v204_v20 }
  0xac   : > { %218 = vst.msk [vmem:[%s165_s25 + $0x8] sm:$0xff] %vm216_vm0, %v207_v21 }
  0xae   : > { %v210_v22 = vpop.f32.mrf.mxu2  ;;  %v213_v23 = vpop.f32.mrf.mxu3 }
  0xaf   : > { %219 = vst.msk [vmem:[%s165_s25 + $0x10] sm:$0xff] %vm216_vm0, %v210_v22 }
  0xb0   : > { %220 = vst.msk [vmem:[%s165_s25 + $0x18] sm:$0xff] %vm216_vm0, %v213_v23 }
  0xb1 PF: > { %s12_s9 = sadd.s32 1, %s350_s9  }
  0xb2   : > { %p9_p5 = scmp.ge.s32.totalorder %s12_s9, 4  }
  0xb4   :  { %11 = sbr.rel (!%p9_p5) target bundleno = 1 (0x1), region = 58 }

</bundles_post_ra>
